<compile_context>
chip_gen: v7x
topology: tpu7x:2x2x1
jax: 0.10.0
libtpu: 0.0.40
codegen_flags: <defaults>
</compile_context>

<pallas_src>
import functools

import jax
import jax.numpy as jnp
from jax.experimental import pallas as pl
from jax.experimental.pallas import tpu as pltpu


# ------------------------------- fused per-batch kernel -------------------------------
def _prior_sp_kernel(zin_ref, win_ref, wproj_ref, temp_ref, bias_ref, o_ref):
    dim = o_ref.shape[1]
    zin = zin_ref[0]                       # (2*Kin, HW): [x taps ; res taps]

    # Input stage: partial 3x3 convs + qv/k 1x1 convs, all pre-fused into a single
    # block-diagonal weight -> one MXU matmul producing q, v, k stacked on sublanes.
    y = jnp.dot(win_ref[...], zin, preferred_element_type=jnp.float32)     # (3*dim, HW)
    q = y[:dim, :]                         # sublane-aligned splits (dim multiple of 8)
    v = y[dim:2 * dim, :]
    k = y[2 * dim:, :]

    def _l2norm(t):                        # torch F.normalize(dim=-1): x / max(||x||, 1e-12)
        n = jnp.sqrt(jnp.sum(t * t, axis=-1, keepdims=True))
        return t / jnp.maximum(n, 1e-12)

    qn = _l2norm(q)
    kn = _l2norm(k)

    # (dim, dim) logits = q @ k^T, contracting over HW without an explicit transpose.
    logits = jax.lax.dot_general(qn, kn, (((1,), (1,)), ((), ())),
                                 preferred_element_type=jnp.float32)
    # per-head temperature (row broadcast) + block-diagonal mask (-1e30 off-head)
    logits = logits * temp_ref[...] + bias_ref[...]
    logits = logits - jnp.max(logits, axis=-1, keepdims=True)
    p = jnp.exp(logits)
    attn = p / jnp.sum(p, axis=-1, keepdims=True)

    # project_out(attn @ v) == (W_proj @ attn) @ v : only one (dim, HW)-wide matmul.
    pa = jnp.dot(wproj_ref[...], attn, preferred_element_type=jnp.float32)  # (dim, dim)
    o_ref[0] = jnp.dot(pa, v, preferred_element_type=jnp.float32)           # (dim, HW)


# ------------------------------------- wrapper glue ------------------------------------
def _im2col_partial(t, cp):
    # (B, C, H, W) -> list of (B, *, H*W) pieces: 9 shifted taps of the first cp channels
    # (zero-padded 3x3 neighborhood) followed by the untouched channels. Tiny tensor op.
    b, c, h, w = t.shape
    tp = jnp.pad(t[:, :cp], ((0, 0), (0, 0), (1, 1), (1, 1)))
    taps = [tp[:, :, di:di + h, dj:dj + w].reshape(b, cp, h * w)
            for di in range(3) for dj in range(3)]
    rest = t[:, cp:].reshape(b, c - cp, h * w)
    return taps + [rest]


def _fuse_input_weight(w1x1, w3, cp):
    # Fold the partial 3x3 conv into the following 1x1 conv:
    #   y = W1[:, :cp] @ conv3(x[:cp]) + W1[:, cp:] @ x[cp:]
    # Columns [t*cp:(t+1)*cp] act on tap t of the im2col input built above.
    wc, wr = w1x1[:, :cp], w1x1[:, cp:]
    taps = [wc @ w3[:, :, di, dj] for di in range(3) for dj in range(3)]
    return jnp.concatenate(taps + [wr], axis=1).astype(jnp.float32)


def prior_sp_forward(x, res, params, *, num_heads=2):
    b, c, h, w = x.shape
    assert x.shape == res.shape and c % 4 == 0 and c % num_heads == 0
    cp = c // 4
    ch = c // num_heads
    hw = h * w
    kin = 9 * cp + (c - cp)

    # Single stacked input (B, 2*Kin, HW): im2col taps of x followed by taps of res.
    zin = jnp.concatenate(_im2col_partial(x, cp) + _im2col_partial(res, cp), axis=1)

    wqv = _fuse_input_weight(params["w_qv_conv"], params["w_qv_pconv"], cp)   # (2c, Kin)
    wk = _fuse_input_weight(params["w_k_conv"], params["w_k_pconv"], cp)      # (c, Kin)
    # Block-diagonal combined weight: rows [q; v; k], cols [x taps | res taps].
    win = jnp.concatenate(
        [jnp.concatenate([wqv, jnp.zeros((2 * c, kin), jnp.float32)], axis=1),
         jnp.concatenate([jnp.zeros((c, kin), jnp.float32), wk], axis=1)],
        axis=0)                                                               # (3c, 2Kin)

    temp_rows = jnp.repeat(params["temperature"].reshape(-1), ch).reshape(c, 1)
    head_id = jnp.arange(c) // ch
    head_bias = jnp.where(head_id[:, None] == head_id[None, :],
                          0.0, -1e30).astype(jnp.float32)                     # (c, c)

    out = pl.pallas_call(
        _prior_sp_kernel,
        grid=(b,),
        in_specs=[
            pl.BlockSpec((1, 2 * kin, hw), lambda i: (i, 0, 0)),
            pl.BlockSpec((3 * c, 2 * kin), lambda i: (0, 0)),
            pl.BlockSpec((c, c), lambda i: (0, 0)),
            pl.BlockSpec((c, 1), lambda i: (0, 0)),
            pl.BlockSpec((c, c), lambda i: (0, 0)),
        ],
        out_specs=pl.BlockSpec((1, c, hw), lambda i: (i, 0, 0)),
        out_shape=jax.ShapeDtypeStruct((b, c, hw), jnp.float32),
        compiler_params=pltpu.CompilerParams(dimension_semantics=("parallel",)),
    )(zin, win, params["w_proj"].astype(jnp.float32), temp_rows, head_bias)
    return out.reshape(b, c, h, w)


# ------------------------------ params & pure-JAX reference ----------------------------
def init_params(key, dim, num_heads):
    cp = dim // 4
    ks = jax.random.split(key, 6)
    n = jax.random.normal
    return dict(
        w_qv_pconv=0.3 * n(ks[0], (cp, cp, 3, 3), jnp.float32),
        w_qv_conv=0.3 * n(ks[1], (2 * dim, dim), jnp.float32),
        w_k_pconv=0.3 * n(ks[2], (cp, cp, 3, 3), jnp.float32),
        w_k_conv=0.3 * n(ks[3], (dim, dim), jnp.float32),
        w_proj=0.3 * n(ks[4], (dim, dim), jnp.float32),
        # torch init is ones((num_heads,1,1)); perturb so the per-head scale is exercised.
        temperature=1.0 + 0.2 * n(ks[5], (num_heads, 1, 1), jnp.float32),
    )


def prior_sp_reference(x, res, params, *, num_heads=2):
    b, c, h, w = x.shape
    cp = c // 4

    def pconv(t, w3):
        y = jax.lax.conv_general_dilated(
            t[:, :cp], w3, (1, 1), ((1, 1), (1, 1)),
            dimension_numbers=("NCHW", "OIHW", "NCHW"))
        return jnp.concatenate([y, t[:, cp:]], axis=1)

    qv = jnp.einsum("bchw,oc->bohw", pconv(x, params["w_qv_pconv"]), params["w_qv_conv"])
    q, v = qv[:, :c], qv[:, c:]
    k = jnp.einsum("bchw,oc->bohw", pconv(res, params["w_k_pconv"]), params["w_k_conv"])

    def heads(t):
        return t.reshape(b, num_heads, c // num_heads, h * w)

    q, k, v = heads(q), heads(k), heads(v)

    def l2n(t):
        nrm = jnp.sqrt(jnp.sum(t * t, axis=-1, keepdims=True))
        return t / jnp.maximum(nrm, 1e-12)

    q, k = l2n(q), l2n(k)
    attn = jnp.einsum("bhcx,bhdx->bhcd", q, k) * params["temperature"][None]
    attn = jax.nn.softmax(attn, axis=-1)
    out = jnp.einsum("bhcd,bhdx->bhcx", attn, v).reshape(b, c, h, w)
    return jnp.einsum("bchw,oc->bohw", out, params["w_proj"])


if __name__ == "__main__":
    jax.config.update("jax_default_matmul_precision", "highest")

    dim, num_heads = 8, 2            # dim_conv3 = dim // 4 = 2, channels per head = 4
    b, h, w = 2, 16, 16
    key = jax.random.PRNGKey(0)
    kx, kr, kp = jax.random.split(key, 3)
    x = jax.random.normal(kx, (b, dim, h, w), jnp.float32)
    res = jax.random.normal(kr, (b, dim, h, w), jnp.float32)
    params = init_params(kp, dim, num_heads)

    fwd = jax.jit(functools.partial(prior_sp_forward, num_heads=num_heads))
    out = jax.block_until_ready(fwd(x, res, params))

    ref = prior_sp_reference(x, res, params, num_heads=num_heads)
    assert out.shape == ref.shape == (b, dim, h, w)
    err = float(jnp.max(jnp.abs(out - ref)))
    if err > 1e-3:
        raise AssertionError(f"mismatch vs pure-JAX reference: max abs err {err}")
    print("KERNEL_OK")
</pallas_src>

<mosaic_0001>
module attributes {stable_mosaic.version = 11 : i64} {
  func.func @_prior_sp_kernel(%arg0: i32, %arg1: memref<1x48x256xf32, #tpu.memory_space<vmem>>, %arg2: memref<24x48xf32, #tpu.memory_space<vmem>>, %arg3: memref<8x8xf32, #tpu.memory_space<vmem>>, %arg4: memref<8x1xf32, #tpu.memory_space<vmem>>, %arg5: memref<8x8xf32, #tpu.memory_space<vmem>>, %arg6: memref<1x8x256xf32, #tpu.memory_space<vmem>>) attributes {dimension_semantics = [#tpu.dimension_semantics<parallel>], iteration_bounds = array<i64: 2>, scalar_prefetch = 0 : i64, scratch_operands = 0 : i64, tpu.core_type = #tpu.core_type<tc>, window_params = [{transform_indices = @transform_0, window_bounds = array<i64: 1, 48, 256>}, {pipeline_mode = #tpu.pipeline_mode<synchronous>, transform_indices = @transform_1, window_bounds = array<i64: 24, 48>}, {pipeline_mode = #tpu.pipeline_mode<synchronous>, transform_indices = @transform_2, window_bounds = array<i64: 8, 8>}, {pipeline_mode = #tpu.pipeline_mode<synchronous>, transform_indices = @transform_3, window_bounds = array<i64: 8, 1>}, {pipeline_mode = #tpu.pipeline_mode<synchronous>, transform_indices = @transform_4, window_bounds = array<i64: 8, 8>}, {transform_indices = @transform_5, window_bounds = array<i64: 1, 8, 256>}]} {
    %c0 = arith.constant 0 : index
    %c0_0 = arith.constant 0 : index
    %c0_1 = arith.constant 0 : index
    %0 = vector.load %arg1[%c0, %c0_0, %c0_1] : memref<1x48x256xf32, #tpu.memory_space<vmem>>, vector<1x48x256xf32>
    %1 = vector.shape_cast %0 : vector<1x48x256xf32> to vector<48x256xf32>
    %c0_2 = arith.constant 0 : index
    %c0_3 = arith.constant 0 : index
    %2 = vector.load %arg2[%c0_2, %c0_3] : memref<24x48xf32, #tpu.memory_space<vmem>>, vector<24x48xf32>
    %cst = arith.constant dense<0.000000e+00> : vector<24x256xf32>
    %3 = tpu.matmul %2, %1, %cst {dimension_numbers = #tpu.dot_dimension_numbers<[1], [0], [0], [1], [0, 0, 1, 1], [], []>, precision = #tpu.contract_precision<fp32>} : vector<24x48xf32>, vector<48x256xf32>, vector<24x256xf32> -> vector<24x256xf32>
    %4 = vector.extract_strided_slice %3 {offsets = [0, 0], sizes = [8, 256], strides = [1, 1]} : vector<24x256xf32> to vector<8x256xf32>
    %5 = vector.extract_strided_slice %3 {offsets = [8, 0], sizes = [8, 256], strides = [1, 1]} : vector<24x256xf32> to vector<8x256xf32>
    %6 = vector.extract_strided_slice %3 {offsets = [16, 0], sizes = [8, 256], strides = [1, 1]} : vector<24x256xf32> to vector<8x256xf32>
    %7 = arith.mulf %4, %4 : vector<8x256xf32>
    %cst_4 = arith.constant dense<0.000000e+00> : vector<8xf32>
    %8 = vector.multi_reduction <add>, %7, %cst_4 [1] : vector<8x256xf32> to vector<8xf32>
    %9 = vector.shape_cast %8 : vector<8xf32> to vector<8x1xf32>
    %10 = math.sqrt %9 : vector<8x1xf32>
    %cst_5 = arith.constant 9.99999996E-13 : f32
    %11 = vector.broadcast %cst_5 : f32 to vector<8x1xf32>
    %12 = arith.maximumf %10, %11 : vector<8x1xf32>
    %13 = vector.broadcast %12 : vector<8x1xf32> to vector<8x256xf32>
    %14 = arith.divf %4, %13 : vector<8x256xf32>
    %15 = arith.mulf %6, %6 : vector<8x256xf32>
    %cst_6 = arith.constant dense<0.000000e+00> : vector<8xf32>
    %16 = vector.multi_reduction <add>, %15, %cst_6 [1] : vector<8x256xf32> to vector<8xf32>
    %17 = vector.shape_cast %16 : vector<8xf32> to vector<8x1xf32>
    %18 = math.sqrt %17 : vector<8x1xf32>
    %cst_7 = arith.constant 9.99999996E-13 : f32
    %19 = vector.broadcast %cst_7 : f32 to vector<8x1xf32>
    %20 = arith.maximumf %18, %19 : vector<8x1xf32>
    %21 = vector.broadcast %20 : vector<8x1xf32> to vector<8x256xf32>
    %22 = arith.divf %6, %21 : vector<8x256xf32>
    %cst_8 = arith.constant dense<0.000000e+00> : vector<8x8xf32>
    %23 = tpu.matmul %14, %22, %cst_8 {dimension_numbers = #tpu.dot_dimension_numbers<[1], [1], [0], [0], [0, 0, 1, 0], [], []>, precision = #tpu.contract_precision<fp32>} : vector<8x256xf32>, vector<8x256xf32>, vector<8x8xf32> -> vector<8x8xf32>
    %c0_9 = arith.constant 0 : index
    %c0_10 = arith.constant 0 : index
    %24 = vector.load %arg4[%c0_9, %c0_10] : memref<8x1xf32, #tpu.memory_space<vmem>>, vector<8x1xf32>
    %25 = vector.broadcast %24 : vector<8x1xf32> to vector<8x8xf32>
    %26 = arith.mulf %23, %25 : vector<8x8xf32>
    %c0_11 = arith.constant 0 : index
    %c0_12 = arith.constant 0 : index
    %27 = vector.load %arg5[%c0_11, %c0_12] : memref<8x8xf32, #tpu.memory_space<vmem>>, vector<8x8xf32>
    %28 = arith.addf %26, %27 : vector<8x8xf32>
    %cst_13 = arith.constant dense<0xFF800000> : vector<8xf32>
    %29 = vector.multi_reduction <maximumf>, %28, %cst_13 [1] : vector<8x8xf32> to vector<8xf32>
    %30 = vector.shape_cast %29 : vector<8xf32> to vector<8x1xf32>
    %31 = vector.broadcast %30 : vector<8x1xf32> to vector<8x8xf32>
    %32 = arith.subf %28, %31 : vector<8x8xf32>
    %33 = math.exp %32 : vector<8x8xf32>
    %cst_14 = arith.constant dense<0.000000e+00> : vector<8xf32>
    %34 = vector.multi_reduction <add>, %33, %cst_14 [1] : vector<8x8xf32> to vector<8xf32>
    %35 = vector.shape_cast %34 : vector<8xf32> to vector<8x1xf32>
    %36 = vector.broadcast %35 : vector<8x1xf32> to vector<8x8xf32>
    %37 = arith.divf %33, %36 : vector<8x8xf32>
    %c0_15 = arith.constant 0 : index
    %c0_16 = arith.constant 0 : index
    %38 = vector.load %arg3[%c0_15, %c0_16] : memref<8x8xf32, #tpu.memory_space<vmem>>, vector<8x8xf32>
    %cst_17 = arith.constant dense<0.000000e+00> : vector<8x8xf32>
    %39 = tpu.matmul %38, %37, %cst_17 {dimension_numbers = #tpu.dot_dimension_numbers<[1], [0], [0], [1], [0, 0, 1, 1], [], []>, precision = #tpu.contract_precision<fp32>} : vector<8x8xf32>, vector<8x8xf32>, vector<8x8xf32> -> vector<8x8xf32>
    %cst_18 = arith.constant dense<0.000000e+00> : vector<8x256xf32>
    %40 = tpu.matmul %39, %5, %cst_18 {dimension_numbers = #tpu.dot_dimension_numbers<[1], [0], [0], [1], [0, 0, 1, 1], [], []>, precision = #tpu.contract_precision<fp32>} : vector<8x8xf32>, vector<8x256xf32>, vector<8x256xf32> -> vector<8x256xf32>
    %c0_19 = arith.constant 0 : index
    %c0_20 = arith.constant 0 : index
    %c0_21 = arith.constant 0 : index
    %41 = vector.load %arg6[%c0_19, %c0_20, %c0_21] : memref<1x8x256xf32, #tpu.memory_space<vmem>>, vector<1x8x256xf32>
    %42 = vector.shape_cast %41 : vector<1x8x256xf32> to vector<8x256xf32>
    %43 = vector.shape_cast %40 : vector<8x256xf32> to vector<1x8x256xf32>
    tpu.vector_store %arg6[%c0_19, %c0_20, %c0_21], %43 {strides = array<i32>} : memref<1x8x256xf32, #tpu.memory_space<vmem>>, vector<1x8x256xf32>,
    return
  }
  func.func @transform_0(%arg0: i32) -> (i32, i32, i32) {
    %c0_i32 = arith.constant 0 : i32
    %c0_i32_0 = arith.constant 0 : i32
    %c0_i32_1 = arith.constant 0 : i32
    return %arg0, %c0_i32, %c0_i32_0 : i32, i32, i32
  }
  func.func @transform_1(%arg0: i32) -> (i32, i32) {
    %c0_i32 = arith.constant 0 : i32
    %c0_i32_0 = arith.constant 0 : i32
    %c0_i32_1 = arith.constant 0 : i32
    return %c0_i32, %c0_i32_0 : i32, i32
  }
  func.func @transform_2(%arg0: i32) -> (i32, i32) {
    %c0_i32 = arith.constant 0 : i32
    %c0_i32_0 = arith.constant 0 : i32
    %c0_i32_1 = arith.constant 0 : i32
    return %c0_i32, %c0_i32_0 : i32, i32
  }
  func.func @transform_3(%arg0: i32) -> (i32, i32) {
    %c0_i32 = arith.constant 0 : i32
    %c0_i32_0 = arith.constant 0 : i32
    %c0_i32_1 = arith.constant 0 : i32
    return %c0_i32, %c0_i32_0 : i32, i32
  }
  func.func @transform_4(%arg0: i32) -> (i32, i32) {
    %c0_i32 = arith.constant 0 : i32
    %c0_i32_0 = arith.constant 0 : i32
    %c0_i32_1 = arith.constant 0 : i32
    return %c0_i32, %c0_i32_0 : i32, i32
  }
  func.func @transform_5(%arg0: i32) -> (i32, i32, i32) {
    %c0_i32 = arith.constant 0 : i32
    %c0_i32_0 = arith.constant 0 : i32
    %c0_i32_1 = arith.constant 0 : i32
    return %arg0, %c0_i32, %c0_i32_0 : i32, i32, i32
  }
}

</mosaic_0001>

<bundles_post_ra>
// kernel: prior_sp_forward.1
= control target key start
LH: loop header
LB: loop body
LE: loop exit
PB: predicated region body
PF: predicated region fallthrough
CT: control target
= control target key end

     0   :  { %s2695_s18 = smov 0   ;;  %s2977_s0 = inlined_call_operand.vmem [shape: f32[2,48,256], index: 0, kind: input, shape index: {}]   ;;  %s2978_s1 = inlined_call_operand.vmem [shape: f32[24,48], index: 1, kind: input, shape index: {}]   ;;  %s2979_s2 = inlined_call_operand.vmem [shape: f32[8,8], index: 2, kind: input, shape index: {}]   ;;  %s2980_s3 = inlined_call_operand.vmem [shape: f32[8,1], index: 3, kind: input, shape index: {}]   ;;  %s2981_s4 = inlined_call_operand.vmem [shape: f32[8,8], index: 4, kind: input, shape index: {}]   ;;  %s2982_s5 = inlined_call_operand.vmem [shape: f32[2,8,256], index: 5, kind: output, shape index: {}]  }
   0x1 LB: > { %s2443_s19 = sadd.s32 4294967295, %s2660_s18   ;;  %p2447_p0 = scmp.ge.s32.totalorder %s2660_s18, 1  ;;  %s2660_s18 = sphi %s2695_s18, %s15_s18  }
   0x2   : > { %p187_p1 = scmp.lt.s32.totalorder %s2660_s18, 3 }
   0x4   : > { %p188_p2 = pnand %p2447_p0, %p187_p1 }
   0x5   : > { %p215_p3 = scmp.lt.s32.totalorder (!%p188_p2), %s2443_s19, 1  ;;  %v237_v0 = vld [vmem:[%s2978_s1] sm:$0xff] (!%p188_p2)  ;;  %vm240_vm0 = vcmask (!%p188_p2), 392192   ;;  %v238_v1 = vld [vmem:[%s2978_s1 + $0x8] sm:$0xff] (!%p188_p2)  ;;  %v239_v2 = vld [vmem:[%s2978_s1 + $0x10] sm:$0xff] (!%p188_p2)  ;;  %v2662_v3 = vmov (!%p188_p2), 0.0  }
   0x6   : > { %191 = sbr.rel (%p188_p2) target bundleno = 1587 (0x633), region = 40  ;;  %326 = vmatprep.mubr.f32.mxu0 (!%p188_p2), %v2662_v3  ;;  %v242_v4 = vsel (!%p188_p2), %vm240_vm0, %v237_v0, 0  ;;  %v245_v5 = vsel (!%p188_p2), %vm240_vm0, %v238_v1, 0  ;;  %v248_v6 = vsel (!%p188_p2), %vm240_vm0, %v239_v2, 0  ;;  %vm1456_vm5 = vcmask (!%p188_p2), 64512  }
   0x7   : > { %v2715_v7 = vand.u32 (!%p188_p2), 4294901760, %v242_v4  ;;  %v2717_v8 = vand.u32 (!%p188_p2), 4294901760, %v245_v5  ;;  %v2719_v9 = vand.u32 (!%p188_p2), 4294901760, %v248_v6  ;;  %vm2664_vm6 = vmmov (!%p188_p2), 0  }
   0x9   : > { %v2723_v10 = vsub.f32 (!%p188_p2), %v242_v4, %v2715_v7  ;;  %v2726_v11 = vsub.f32 (!%p188_p2), %v245_v5, %v2717_v8  ;;  %v2729_v12 = vsub.f32 (!%p188_p2), %v248_v6, %v2719_v9 }
   0xb   : > { %v329_v13 = vand.u32 (!%p188_p2), 4294901760, %v2723_v10  ;;  %v340_v14 = vand.u32 (!%p188_p2), 4294901760, %v2726_v11  ;;  %v351_v18 = vand.u32 (!%p188_p2), 4294901760, %v2729_v12 }
   0xd   : > { %s2984_s19 = smov (!%p215_p3, %s2443_s19), 1  ;;  %v2740_v31 = vsub.f32 %v2723_v10, %v329_v13  ;;  %v2751_v38 = vsub.f32 %v2726_v11, %v340_v14 }
   0xe   : > { %s2628_s26 = smul.u32 96, %s2984_s19  ;;  %s2453_s11 = sshll.u32 %s2984_s19, 4 }
   0xf   : > { %v331_v54 = vand.u32 4294901760, %v2740_v31  ;;  %s224_s14 = scalar_lea.vmem %s2982_s5, %s2453_s11 }
  0x10   : > { %s219_s29 = scalar_lea.vmem %s2977_s0, %s2628_s26 }
  0x11   : > { %v226_v15 = vld [vmem:[%s219_s29 + $0x8] sm:$0xff]  ;;  %v228_v16 = vld [vmem:[%s219_s29 + $0x18] sm:$0xff]  ;;  %v225_v17 = vld [vmem:[%s219_s29] sm:$0xff] }
  0x12   : > { %v250_v19 = vand.u32 4294901760, %v226_v15  ;;  %v254_v20 = vand.u32 4294901760, %v228_v16  ;;  %v227_v21 = vld [vmem:[%s219_s29 + $0x10] sm:$0xff]  ;;  %v252_v22 = vand.u32 4294901760, %v225_v17  ;;  %v230_v23 = vld [vmem:[%s219_s29 + $0x28] sm:$0xff]  ;;  %v232_v24 = vld [vmem:[%s219_s29 + $0x38] sm:$0xff] }
  0x13   : > { %v256_v25 = vand.u32 4294901760, %v227_v21  ;;  %v258_v26 = vand.u32 4294901760, %v230_v23  ;;  %v262_v27 = vand.u32 4294901760, %v232_v24  ;;  %v229_v28 = vld [vmem:[%s219_s29 + $0x20] sm:$0xff]  ;;  %v231_v29 = vld [vmem:[%s219_s29 + $0x30] sm:$0xff]  ;;  %v234_v30 = vld [vmem:[%s219_s29 + $0x48] sm:$0xff] }
  0x14   : > { %v2742_v32 = vpack.c.bf16 %v254_v20, %v250_v19  ;;  %v2744_v33 = vsub.f32 %v226_v15, %v250_v19  ;;  %v2746_v34 = vsub.f32 %v228_v16, %v254_v20  ;;  %v236_v35 = vld [vmem:[%s219_s29 + $0x58] sm:$0xff]  ;;  %v233_v36 = vld [vmem:[%s219_s29 + $0x40] sm:$0xff]  ;;  %v235_v37 = vld [vmem:[%s219_s29 + $0x50] sm:$0xff]  ;;  %v2755_v40 = vsub.f32 %v225_v17, %v252_v22 }
  0x15   : > { %v2753_v39 = vpack.c.bf16 %v256_v25, %v252_v22  ;;  %v2757_v41 = vsub.f32 %v227_v21, %v256_v25  ;;  %v2759_v42 = vpack.c.bf16 %v262_v27, %v258_v26  ;;  %v2762_v43 = vsub.f32 %v230_v23, %v258_v26 }
  0x16   : > { %2497 = vmatprep.subr.bf16.mxu0 %v2742_v32  ;;  %v260_v44 = vand.u32 4294901760, %v229_v28  ;;  %v264_v45 = vand.u32 4294901760, %v231_v29  ;;  %v266_v46 = vand.u32 4294901760, %v234_v30  ;;  %v2765_v47 = vsub.f32 %v232_v24, %v262_v27 }
  0x17   : > { %2499 = vmatpush1.bf16.msra.mxu0 %v2753_v39  ;;  %v270_v48 = vand.u32 4294901760, %v236_v35  ;;  %v268_v49 = vand.u32 4294901760, %v233_v36  ;;  %v272_v50 = vand.u32 4294901760, %v235_v37  ;;  %v362_v60 = vand.u32 4294901760, %v2744_v33 }
  0x18   : > { %2501 = vmatprep.subr.bf16.mxu0 %v2759_v42  ;;  %v2768_v51 = vpack.c.bf16 %v264_v45, %v260_v44  ;;  %v2770_v52 = vsub.f32 %v229_v28, %v260_v44  ;;  %v2772_v53 = vsub.f32 %v231_v29, %v264_v45  ;;  %v2777_v56 = vsub.f32 %v234_v30, %v266_v46 }
  0x19   : > { %v2775_v55 = vpack.c.bf16 %v270_v48, %v266_v46  ;;  %v2779_v57 = vsub.f32 %v236_v35, %v270_v48  ;;  %v2781_v58 = vpack.c.bf16 %v272_v50, %v268_v49  ;;  %v2783_v59 = vsub.f32 %v233_v36, %v268_v49 }
  0x1a   : > { %v374_v61 = vand.u32 4294901760, %v2746_v34  ;;  %v368_v62 = vand.u32 4294901760, %v2755_v40  ;;  %v2789_v63 = vsub.f32 %v235_v37, %v272_v50  ;;  %v380_v0 = vand.u32 4294901760, %v2757_v41 }
  0x1b   : > { %2503 = vmatpush1.bf16.msra.mxu0 %v2768_v51  ;;  %v386_v1 = vand.u32 4294901760, %v2762_v43  ;;  %v398_v2 = vand.u32 4294901760, %v2765_v47  ;;  %v363_v4 = vsub.f32 %v2744_v33, %v362_v60  ;;  %v392_v15 = vand.u32 4294901760, %v2770_v52 }
  0x1c   : > { %2505 = vmatprep.subr.bf16.mxu0 %v2775_v55  ;;  %v375_v5 = vsub.f32 %v2746_v34, %v374_v61  ;;  %v369_v6 = vsub.f32 %v2755_v40, %v368_v62  ;;  %v381_v16 = vsub.f32 %v2757_v41, %v380_v0  ;;  %v404_v20 = vand.u32 4294901760, %v2772_v53 }
  0x1d   : > { %v387_v17 = vsub.f32 %v2762_v43, %v386_v1  ;;  %v399_v19 = vsub.f32 %v2765_v47, %v398_v2  ;;  %v364_v21 = vand.u32 4294901760, %v363_v4  ;;  %v393_v24 = vsub.f32 %v2770_v52, %v392_v15 }
  0x1e   : > { %v376_v22 = vand.u32 4294901760, %v375_v5  ;;  %v370_v23 = vand.u32 4294901760, %v369_v6  ;;  %v382_v25 = vand.u32 4294901760, %v381_v16  ;;  %v405_v28 = vsub.f32 %v2772_v53, %v404_v20 }
  0x1f   : > { %2507 = vmatpush1.bf16.msra.mxu0 %v2781_v58  ;;  %v388_v26 = vand.u32 4294901760, %v387_v17  ;;  %v400_v27 = vand.u32 4294901760, %v399_v19  ;;  %v342_v30 = vand.u32 4294901760, %v2751_v38  ;;  %v394_v31 = vand.u32 4294901760, %v393_v24 }
  0x20   : > { %v2508_v29 = vpack.c.bf16 %v376_v22, %v364_v21  ;;  %v410_v35 = vand.u32 4294901760, %v2777_v56  ;;  %v2510_v36 = vpack.c.bf16 %v382_v25, %v370_v23  ;;  %v406_v44 = vand.u32 4294901760, %v405_v28 }
  0x21   : > { %v2512_v37 = vpack.c.bf16 %v400_v27, %v388_v26  ;;  %v422_v45 = vand.u32 4294901760, %v2779_v57  ;;  %v352_v46 = vsub.f32 %v2729_v12, %v351_v18  ;;  %v416_v38 = vand.u32 4294901760, %v2783_v59 }
  0x22   : > { %332 = vmatmul.mubr.f32.vlgmr.msra.gmra.mrb[0].mxu0 %v331_v54  ;;  %2509 = vmatprep.subr.bf16.mxu0 %v2508_v29  ;;  %v411_v48 = vsub.f32 %v2777_v56, %v410_v35  ;;  %v428_v49 = vand.u32 4294901760, %v2789_v63  ;;  %v2514_v50 = vpack.c.bf16 %v406_v44, %v394_v31  ;;  %v2520_v24 = vpack.c.bf16 %v2746_v34, %v2744_v33 }
  0x23   : > { %2511 = vmatpush1.bf16.msra.mxu0 %v2510_v36  ;;  %337 = vmatprep.mubr.f32.mxu0 %v2662_v3  ;;  %v423_v54 = vsub.f32 %v2779_v57, %v422_v45  ;;  %v417_v5 = vsub.f32 %v2783_v59, %v416_v38  ;;  %v353_v17 = vand.u32 4294901760, %v352_v46  ;;  %v2522_v25 = vpack.c.bf16 %v2757_v41, %v2755_v40 }
  0x24   : > { %2513 = vmatprep.subr.bf16.mxu0 %v2512_v37  ;;  %v412_v4 = vand.u32 4294901760, %v411_v48  ;;  %v429_v6 = vsub.f32 %v2789_v63, %v428_v49  ;;  %v2524_v26 = vpack.c.bf16 %v2765_v47, %v2762_v43  ;;  %v2526_v27 = vpack.c.bf16 %v2772_v53, %v2770_v52 }
  0x25   : > { %v424_v16 = vand.u32 4294901760, %v423_v54  ;;  %v418_v19 = vand.u32 4294901760, %v417_v5  ;;  %v2528_v28 = vpack.c.bf16 %v2779_v57, %v2777_v56  ;;  %v2530_v29 = vpack.c.bf16 %v2789_v63, %v2783_v59 }
  0x26   : > { %343 = vmatmul.mubr.f32.gmra.mrb[2].mxu0 %v342_v30  ;;  %v430_v21 = vand.u32 4294901760, %v429_v6  ;;  %v2544_v30 = vpack.c.bf16 %v374_v61, %v362_v60  ;;  %v2546_v31 = vpack.c.bf16 %v380_v0, %v368_v62  ;;  %v2548_v33 = vpack.c.bf16 %v398_v2, %v386_v1 }
  0x27   : > { %2515 = vmatpush1.bf16.msra.mxu0 %v2514_v50  ;;  %348 = vmatprep.mubr.f32.mxu0 %v2662_v3  ;;  %v2516_v22 = vpack.c.bf16 %v424_v16, %v412_v4  ;;  %v2550_v34 = vpack.c.bf16 %v404_v20, %v392_v15  ;;  %v2552_v40 = vpack.c.bf16 %v422_v45, %v410_v35 }
  0x28   : > { %v2518_v23 = vpack.c.bf16 %v430_v21, %v418_v19 }
  0x29   : > { %2517 = vmatprep.subr.bf16.mxu0 %v2516_v22 }
  0x2a   : > { %354 = vmatmul.mubr.f32.gmra.mrb[4].mxu0 %v353_v17 }
  0x2b   : > { %2519 = vmatpush1.bf16.msra.mxu0 %v2518_v23  ;;  %484 = vmatprep.mubr.f32.mxu0 %v2662_v3 }
  0x2c   : > { %2521 = vmatprep.subr.bf16.mxu0 %v2520_v24 }
  0x2e   : > { %486 = vmatmul.mubr.f32.vlgmr.msra.gmra.mrb[0].mxu0 %v2715_v7 }
  0x2f   : > { %2523 = vmatpush1.bf16.msra.mxu0 %v2522_v25  ;;  %491 = vmatprep.mubr.f32.mxu0 %v2662_v3 }
  0x30   : > { %2525 = vmatprep.subr.bf16.mxu0 %v2524_v26 }
  0x32   : > { %493 = vmatmul.mubr.f32.gmra.mrb[2].mxu0 %v2717_v8 }
  0x33   : > { %2527 = vmatpush1.bf16.msra.mxu0 %v2526_v27  ;;  %498 = vmatprep.mubr.f32.mxu0 %v2662_v3 }
  0x34   : > { %2529 = vmatprep.subr.bf16.mxu0 %v2528_v28 }
  0x36   : > { %500 = vmatmul.mubr.f32.gmra.mrb[4].mxu0 %v2719_v9 }
  0x37   : > { %2531 = vmatpush1.bf16.msra.mxu0 %v2530_v29  ;;  %594 = vmatprep.mubr.f32.mxu0 %v2662_v3  ;;  %v1454_v29 = vld [vmem:[%s2981_s4] sm:$0xff] }
  0x38   : > { %2533 = vmatprep.subr.bf16.mxu0 %v2742_v32 }
  0x3a   : > { %597 = vmatmul.mubr.f32.vlgmr.msra.gmra.mrb[0].mxu0 %v2723_v10  ;;  %v2554_v10 = vpack.c.bf16 %v428_v49, %v416_v38 }
  0x3b   : > { %2535 = vmatpush1.bf16.msra.mxu0 %v2753_v39  ;;  %602 = vmatprep.mubr.f32.mxu0 %v2662_v3 }
  0x3c   : > { %2537 = vmatprep.subr.bf16.mxu0 %v2759_v42 }
  0x3e   : > { %605 = vmatmul.mubr.f32.gmra.mrb[2].mxu0 %v2726_v11 }
  0x3f   : > { %2539 = vmatpush1.bf16.msra.mxu0 %v2768_v51  ;;  %610 = vmatprep.mubr.f32.mxu0 %v2662_v3 }
  0x40   : > { %2541 = vmatprep.subr.bf16.mxu0 %v2775_v55 }
  0x42   : > { %613 = vmatmul.mubr.f32.gmra.mrb[4].mxu0 %v2729_v12 }
  0x43   : > { %2543 = vmatpush1.bf16.msra.mxu0 %v2781_v58  ;;  %695 = vmatprep.mubr.f32.mxu0 %v2662_v3 }
  0x44   : > { %2545 = vmatprep.subr.bf16.mxu0 %v2544_v30 }
  0x46   : > { %699 = vmatmul.mubr.f32.vlgmr.msra.gmra.mrb[0].mxu0 %v329_v13 }
  0x47   : > { %2547 = vmatpush1.bf16.msra.mxu0 %v2546_v31  ;;  %704 = vmatprep.mubr.f32.mxu0 %v2662_v3 }
  0x48   : > { %2549 = vmatprep.subr.bf16.mxu0 %v2548_v33 }
  0x4a   : > { %708 = vmatmul.mubr.f32.gmra.mrb[2].mxu0 %v340_v14 }
  0x4b   : > { %2551 = vmatpush1.bf16.msra.mxu0 %v2550_v34  ;;  %713 = vmatprep.mubr.f32.mxu0 %v2662_v3 }
  0x4c   : > { %2553 = vmatprep.subr.bf16.mxu0 %v2552_v40 }
  0x4e   : > { %717 = vmatmul.mubr.f32.gmra.mrb[4].mxu0 %v351_v18 }
  0x4f   : > { %2555 = vmatpush1.bf16.msra.mxu0 %v2554_v10  ;;  %823 = vmatprep.mubr.f32.mxu0 %v2662_v3 }
  0x50   : > { %2557 = vmatprep.subr.bf16.mxu0 %v2742_v32 }
  0x52   : > { %825 = vmatmul.mubr.f32.vlgmr.msra.gmra.mrb[0].mxu0 %v2715_v7 }
  0x53   : > { %2559 = vmatpush1.bf16.msra.mxu0 %v2753_v39  ;;  %830 = vmatprep.mubr.f32.mxu0 %v2662_v3 }
  0x54   : > { %2561 = vmatprep.subr.bf16.mxu0 %v2759_v42 }
  0x56   : > { %832 = vmatmul.mubr.f32.gmra.mrb[2].mxu0 %v2717_v8 }
  0x57   : > { %2563 = vmatpush1.bf16.msra.mxu0 %v2768_v51  ;;  %837 = vmatprep.mubr.f32.mxu0 %v2662_v3 }
  0x58   : > { %2565 = vmatprep.subr.bf16.mxu0 %v2775_v55 }
  0x5a   : > { %839 = vmatmul.mubr.f32.gmra.mrb[4].mxu0 %v2719_v9 }
  0x5b   : > { %2567 = vmatpush1.bf16.msra.mxu0 %v2781_v58  ;;  %921 = vmatprep.mubr.f32.mxu0 %v2662_v3 }
  0x5e   : > { %923 = vmatmul.mubr.f32.vlgmr.msra.gmra.mrb[0].mxu0 %v2715_v7 }
  0x5f   : > { %928 = vmatprep.mubr.f32.mxu0 %v2662_v3 }
  0x62   : > { %930 = vmatmul.mubr.f32.gmra.mrb[2].mxu0 %v2717_v8  ;;  %v1447_v8 = vld [vmem:[%s2980_s3] sm:$0xff] }
  0x63   : > { %935 = vmatprep.mubr.f32.mxu0 %v2662_v3 }
  0x66   : > { %937 = vmatmul.mubr.f32.gmra.mrb[4].mxu0 %v2719_v9  ;;  %v2663_v9 = vmov 0  }
  0x67   : > { %2640 = vset.pattern.permute.xlu1 %v2663_v9  ;;  %2641 = vset.pattern.permute.xlu0 %v2663_v9 }
  0x68   : > { %1450 = vperm.xlu1 %2640, %v1447_v8  }
  0xe7   : > { %v1451_v27 = vpop.permute.xlu1 %1450 }
 0x131   : > { %v924_v11 = vpop.f32.mrb[0].mxu0 }
 0x132   : > { %v943_v12 = vmul.f32 %v924_v11, %v924_v11  ;;  %v926_v13 = vpop.f32.mrb[1].mxu0 }
 0x133   : > { %v944_v14 = vmul.f32 %v926_v13, %v926_v13 }
 0x135   : > { %v2925_v18 = vpop.f32.mrb[2].mxu0  ;;  %v945_v32 = vadd.f32 %v944_v14, %v943_v12  ;;  %v1468_v14 = vld [vmem:[%s2979_s2] sm:$0xff] }
 0x136   : > { %v2927_v39 = vpop.f32.mrb[3].mxu0 }
 0x137   : > { %946 = vadd.xlane.f32.xlu0 %v945_v32  ;;  %v1470_v32 = vsel %vm1456_vm5, %v1468_v14, 0 }
 0x139   : > { %v938_v41 = vpop.f32.mrb[4].mxu0 }
 0x13a   : > { %v959_v7 = vmul.f32 %v938_v41, %v938_v41  ;;  %v940_v42 = vpop.f32.mrb[5].mxu0 }
 0x13b   : > { %v960_v43 = vmul.f32 %v940_v42, %v940_v42 }
 0x13d   : > { %v961_v47 = vadd.f32 %v960_v43, %v959_v7 }
 0x13f   : > { %962 = vadd.xlane.f32.xlu0 %v961_v47 }
 0x1c4   : > { %v947_v51 = vpop.xlane.xlu0 %946 }
 0x1c5   : > { %2642 = vrsqrt.f32 %v947_v51  ;;  %vm950_vm1 = vcmp.eq.f32.partialorder %v947_v51, inf  ;;  %v953_v56 = vand.u32 2147483648, %v947_v51  ;;  %vm952_vm2 = vcmp.eq.f32.partialorder %v947_v51, 0.0 }
 0x1cc   : > { %v963_v52 = vpop.xlane.xlu0 %962 }
 0x1cd   : > { %2644 = vrsqrt.f32 %v963_v52  ;;  %vm966_vm3 = vcmp.eq.f32.partialorder %v963_v52, inf  ;;  %v969_v62 = vand.u32 2147483648, %v963_v52  ;;  %vm968_vm4 = vcmp.eq.f32.partialorder %v963_v52, 0.0 }
 0x1cf   : > { %v2643_v53 = vpop.eup %2642 }
 0x1d0   : > { %v949_v55 = vmul.f32 %v2643_v53, %v947_v51 }
 0x1d2   : > { %v951_v57 = vsel %vm950_vm1, %v947_v51, %v949_v55 }
 0x1d3   : > { %v954_v58 = vsel %vm952_vm2, %v953_v56, %v951_v57 }
 0x1d4   : > { %v955_v59 = vmax.f32 %v954_v58, 1e-12  ;;  %v1921_v58 = vand.u32 4294901760, %v2927_v39 }
 0x1d6   : > { %2646 = vrcp.f32 %v955_v59  ;;  %v2000_v59 = vsub.f32 %v2927_v39, %v1921_v58 }
 0x1d7   : > { %v2645_v60 = vpop.eup %2644 }
 0x1d8   : > { %v965_v61 = vmul.f32 %v2645_v60, %v963_v52  ;;  %v2001_v60 = vand.u32 4294901760, %v2000_v59 }
 0x1da   : > { %v967_v63 = vsel %vm966_vm3, %v963_v52, %v965_v61  ;;  %v2002_v61 = vsub.f32 %v2000_v59, %v2001_v60 }
 0x1db   : > { %v970_v0 = vsel %vm968_vm4, %v969_v62, %v967_v63  ;;  %v1923_v62 = vand.u32 4294901760, %v2925_v18 }
 0x1dc   : > { %v971_v1 = vmax.f32 %v970_v0, 1e-12  ;;  %v2003_v63 = vand.u32 4294901760, %v2002_v61 }
 0x1dd   : > { %v2006_v0 = vsub.f32 %v2925_v18, %v1923_v62 }
 0x1de   : > { %2648 = vrcp.f32 %v971_v1 }
 0x1e0   : > { %v2647_v2 = vpop.eup %2646 }
 0x1e1   : > { %v958_v15 = vmul.f32 %v2647_v2, %v926_v13  ;;  %v957_v20 = vmul.f32 %v2647_v2, %v924_v11 }
 0x1e3   : > { %v1041_v35 = vand.u32 4294901760, %v958_v15  ;;  %v1047_v36 = vand.u32 4294901760, %v957_v20 }
 0x1e5   : > { %v1042_v37 = vsub.f32 %v958_v15, %v1041_v35  ;;  %v1048_v44 = vsub.f32 %v957_v20, %v1047_v36  ;;  %v2007_v20 = vand.u32 4294901760, %v2006_v0 }
 0x1e7   : > { %v1043_v45 = vand.u32 4294901760, %v1042_v37  ;;  %v1049_v46 = vand.u32 4294901760, %v1048_v44 }
 0x1e8   : > { %v2649_v48 = vpop.eup %2648 }
 0x1e9   : > { %v974_v38 = vmul.f32 %v2649_v48, %v940_v42  ;;  %v1044_v49 = vsub.f32 %v1042_v37, %v1043_v45  ;;  %v973_v50 = vmul.f32 %v2649_v48, %v938_v41  ;;  %v1050_v6 = vsub.f32 %v1048_v44, %v1049_v46 }
 0x1ea   : > { %v1538_v41 = vand.u32 4294901760, %v1470_v32 }
 0x1eb   : > { %v975_v54 = vand.u32 4294901760, %v974_v38  ;;  %v1045_v4 = vand.u32 4294901760, %v1044_v49  ;;  %v977_v5 = vand.u32 4294901760, %v973_v50  ;;  %v1051_v19 = vand.u32 4294901760, %v1050_v6 }
 0x1ec   : > { %v1539_v42 = vsub.f32 %v1470_v32, %v1538_v41 }
 0x1ed   : > { %976 = vmatprep.subr.mxu1 %v975_v54  ;;  %1046 = vmatprep.mubr.f32.mxu1 %v1045_v4  ;;  %v1064_v16 = vsub.f32 %v973_v50, %v977_v5  ;;  %v1058_v17 = vsub.f32 %v974_v38, %v975_v54 }
 0x1ee   : > { %978 = vmatpush1.xpose.msra.mxu1 %v977_v5  ;;  %v1540_v43 = vand.u32 4294901760, %v1539_v42 }
 0x1ef   : > { %v1059_v21 = vand.u32 4294901760, %v1058_v17  ;;  %v1065_v22 = vand.u32 4294901760, %v1064_v16 }
 0x1f0   : > { %v1541_v47 = vsub.f32 %v1539_v42, %v1540_v43 }
 0x1f1   : > { %1052 = vmatmul.mubr.f32.vlgmr.msra.gmra.mrb[0].mxu1 %v1051_v19  ;;  %v1060_v23 = vsub.f32 %v1058_v17, %v1059_v21  ;;  %v1066_v24 = vsub.f32 %v1064_v16, %v1065_v22 }
 0x1f2   : > { %1132 = vmatprep.mubr.f32.mxu1 %v1041_v35  ;;  %v1542_v51 = vand.u32 4294901760, %v1541_v47 }
 0x1f3   : > { %v1061_v25 = vand.u32 4294901760, %v1060_v23  ;;  %v1067_v26 = vand.u32 4294901760, %v1066_v24 }
 0x1f5   : > { %1062 = vmatprep.subr.mxu1 %v1061_v25 }
 0x1f6   : > { %1068 = vmatpush1.xpose.msra.mxu1 %v1067_v26 }
 0x1f7   : > { %1141 = vmatprep.subr.mxu1 %v1058_v17 }
 0x1f9   : > { %1134 = vmatmul.mubr.f32.vlgmr.msra.gmra.mrb[0].mxu1 %v1047_v36 }
 0x1fa   : > { %1144 = vmatpush1.xpose.msra.mxu1 %v1064_v16  ;;  %1209 = vmatprep.mubr.f32.mxu1 %v1042_v37  ;;  %v2008_v37 = vsub.f32 %v2006_v0, %v2007_v20 }
 0x1fb   : > { %1218 = vmatprep.subr.mxu1 %v975_v54 }
 0x201   : > { %1212 = vmatmul.mubr.f32.vlgmr.msra.gmra.mrb[0].mxu1 %v1048_v44 }
 0x202   : > { %1220 = vmatpush1.xpose.msra.mxu1 %v977_v5  ;;  %1286 = vmatprep.mubr.f32.mxu1 %v1043_v45 }
 0x203   : > { %1298 = vmatprep.subr.mxu1 %v1059_v21 }
 0x209   : > { %1290 = vmatmul.mubr.f32.vlgmr.msra.gmra.mrb[0].mxu1 %v1049_v46  ;;  %v2009_v46 = vand.u32 4294901760, %v2008_v37 }
 0x20a   : > { %1302 = vmatpush1.xpose.msra.mxu1 %v1065_v22  ;;  %1366 = vmatprep.mubr.f32.mxu1 %v1041_v35 }
 0x20b   : > { %1374 = vmatprep.subr.mxu1 %v975_v54 }
 0x211   : > { %1368 = vmatmul.mubr.f32.vlgmr.msra.gmra.mrb[0].mxu1 %v1047_v36 }
 0x212   : > { %1376 = vmatpush1.xpose.msra.mxu1 %v977_v5  ;;  %1440 = vmatprep.mubr.f32.mxu1 %v1041_v35 }
 0x213   : > { %2466 = vmatprep.subr.mxu1 %v2662_v3 }
 0x219   : > { %1442 = vmatmul.mubr.f32.vlgmr.msra.gmra.mrb[0].mxu1 %v1047_v36 }
 0x21a   : > { %2468 = vmatprep.mubr.msk.f32.mxu1 %vm2664_vm6, %v2662_v3 }
 0x2ec   : > { %v1443_v28 = vpop.f32.mrb[0].mxu1 }
 0x2ed   : > { %v1453_v30 = vmul.f32 %v1451_v27, %v1443_v28  ;;  %v1445_v31 = vpop.f32.mrb[1].mxu1 }
 0x2ef   : > { %v1455_v33 = vadd.f32 %v1454_v29, %v1453_v30 }
 0x2f1   : > { %v1457_v34 = vsel %vm1456_vm5, %v1455_v33, -inf }
 0x2f2   : > { %1458 = vmax.xlane.f32.xlu1 %v1457_v34 }
 0x37f   : > { %v1459_v40 = vpop.xlane.xlu1 %1458 }
 0x380   : > { %v1460_v10 = vsub.f32 %v1455_v33, %v1459_v40 }
 0x382   : > { %v1461_v11 = vmul.f32 1.442695, %v1460_v10 }
 0x384   : > { %2650 = vpow2.f32 %v1461_v11 }
 0x38e   : > { %v2651_v12 = vpop.eup %2650 }
 0x38f   : > { %v1463_v13 = vsel %vm1456_vm5, %v2651_v12, 0.0 }
 0x390   : > { %1464 = vadd.xlane.f32.xlu0 %v1463_v13 }
 0x41d   : > { %v1465_v7 = vpop.xlane.xlu0 %1464 }
 0x41e   : > { %2652 = vrcp.f32 %v1465_v7 }
 0x428   : > { %v2653_v8 = vpop.eup %2652 }
 0x429   : > { %v1467_v9 = vmul.f32 %v2653_v8, %v2651_v12 }
 0x42b   : > { %v1473_v52 = vand.u32 4294901760, %v1467_v9 }
 0x42d   : > { %2467 = vmatpush3.msra.mxu1 %v1473_v52  ;;  %v1550_v53 = vsub.f32 %v1467_v9, %v1473_v52 }
 0x42e   : > { %2469 = vmatmul.mubr.f32.vlgmr.msra.gmra.mrb[2].mxu1 %v1542_v51  ;;  %2471 = vmatprep.subr.mxu1 %v2662_v3 }
 0x42f   : > { %v1551_v55 = vand.u32 4294901760, %v1550_v53  ;;  %2473 = vmatprep.mubr.msk.f32.mxu1 %vm2664_vm6, %v2662_v3 }
 0x431   : > { %v1552_v56 = vsub.f32 %v1550_v53, %v1551_v55 }
 0x433   : > { %v1553_v57 = vand.u32 4294901760, %v1552_v56 }
 0x435   : > { %2472 = vmatpush3.msra.mxu1 %v1553_v57 }
 0x436   : > { %2474 = vmatmul.mubr.f32.vlgmr.msra.gmra.mrb[2].mxu1 %v1538_v41  ;;  %2476 = vmatprep.subr.mxu1 %v2662_v3 }
 0x437   : > { %2477 = vmatpush3.msra.mxu1 %v1550_v53  ;;  %2478 = vmatprep.mubr.msk.f32.mxu1 %vm2664_vm6, %v2662_v3 }
 0x438   : > { %2481 = vmatprep.subr.mxu1 %v2662_v3 }
 0x43e   : > { %2479 = vmatmul.mubr.f32.vlgmr.msra.gmra.mrb[2].mxu1 %v1539_v42 }
 0x43f   : > { %2482 = vmatpush3.msra.mxu1 %v1473_v52  ;;  %2483 = vmatprep.mubr.msk.f32.mxu1 %vm2664_vm6, %v2662_v3 }
 0x440   : > { %2486 = vmatprep.subr.mxu1 %v2662_v3 }
 0x446   : > { %2484 = vmatmul.mubr.f32.vlgmr.msra.gmra.mrb[2].mxu1 %v1540_v43 }
 0x447   : > { %2487 = vmatpush3.msra.mxu1 %v1551_v55  ;;  %2488 = vmatprep.mubr.msk.f32.mxu1 %vm2664_vm6, %v2662_v3 }
 0x448   : > { %2491 = vmatprep.subr.mxu1 %v2662_v3 }
 0x44e   : > { %2489 = vmatmul.mubr.f32.vlgmr.msra.gmra.mrb[2].mxu1 %v1538_v41 }
 0x44f   : > { %2492 = vmatpush3.msra.mxu1 %v1473_v52  ;;  %2493 = vmatprep.mubr.msk.f32.mxu1 %vm2664_vm6, %v2662_v3 }
 0x450   : > { %1922 = vmatprep.subr.mxu1 %v1921_v58 }
 0x456   : > { %2494 = vmatmul.mubr.f32.vlgmr.msra.gmra.mrb[2].mxu1 %v1538_v41 }
 0x457   : > { %1924 = vmatpush1.msra.mxu1 %v1923_v62  ;;  %1987 = vmatprep.mubr.f32.mxu1 %v2662_v3 }
 0x458   : > { %2004 = vmatprep.subr.mxu1 %v2003_v63 }
 0x529   : > { %v1914_v1 = vpop.f32.mrb[2].mxu1 }
 0x52a   : > { %v1919_v39 = vsel %vm1456_vm5, %v1914_v1, 0  ;;  %v2495_v2 = vpop.f32.mrb[3].mxu1 }
 0x52b   : > { %v1988_v15 = vand.u32 4294901760, %v1919_v39 }
 0x52d   : > { %v1989_v35 = vsub.f32 %v1919_v39, %v1988_v15 }
 0x52f   : > { %v1990_v36 = vand.u32 4294901760, %v1989_v35 }
 0x531   : > { %v1991_v44 = vsub.f32 %v1989_v35, %v1990_v36 }
 0x533   : > { %v1992_v45 = vand.u32 4294901760, %v1991_v44 }
 0x535   : > { %1993 = vmatmul.mubr.f32.vlgmr.msra.gmra.mrb[4].mxu1 %v1992_v45 }
 0x536   : > { %2010 = vmatpush1.msra.mxu1 %v2009_v46  ;;  %2073 = vmatprep.mubr.f32.mxu1 %v2662_v3 }
 0x537   : > { %2083 = vmatprep.subr.mxu1 %v2000_v59 }
 0x53d   : > { %2075 = vmatmul.mubr.f32.vlgmr.msra.gmra.mrb[4].mxu1 %v1988_v15 }
 0x53e   : > { %2086 = vmatpush1.msra.mxu1 %v2006_v0  ;;  %2149 = vmatprep.mubr.f32.mxu1 %v2662_v3 }
 0x53f   : > { %2159 = vmatprep.subr.mxu1 %v1921_v58 }
 0x545   : > { %2152 = vmatmul.mubr.f32.vlgmr.msra.gmra.mrb[4].mxu1 %v1989_v35 }
 0x546   : > { %2161 = vmatpush1.msra.mxu1 %v1923_v62  ;;  %2224 = vmatprep.mubr.f32.mxu1 %v2662_v3 }
 0x547   : > { %2237 = vmatprep.subr.mxu1 %v2001_v60 }
 0x54d   : > { %2228 = vmatmul.mubr.f32.vlgmr.msra.gmra.mrb[4].mxu1 %v1990_v36 }
 0x54e   : > { %2241 = vmatpush1.msra.mxu1 %v2007_v20  ;;  %2304 = vmatprep.mubr.f32.mxu1 %v2662_v3 }
 0x54f   : > { %2313 = vmatprep.subr.mxu1 %v1921_v58 }
 0x555   : > { %2306 = vmatmul.mubr.f32.vlgmr.msra.gmra.mrb[4].mxu1 %v1988_v15 }
 0x556   : > { %2315 = vmatpush1.msra.mxu1 %v1923_v62  ;;  %2378 = vmatprep.mubr.f32.mxu1 %v2662_v3 }
 0x55d   : > { %2380 = vmatmul.mubr.f32.vlgmr.msra.gmra.mrb[4].mxu1 %v1988_v15 }
 0x630   : > { %v2381_v18 = vpop.f32.mrb[4].mxu1 }
 0x631   : > { %2386 = vst [vmem:[%s224_s14] sm:$0xff] %v2381_v18  ;;  %v2383_v48 = vpop.f32.mrb[5].mxu1 }
 0x632   : > { %2387 = vst [vmem:[%s224_s14 + $0x8] sm:$0xff] %v2383_v48 }
 0x633 PF: > { %s15_s18 = sadd.s32 1, %s2660_s18  }
 0x634   : > { %p12_p4 = scmp.ge.s32.totalorder %s15_s18, 4  }
 0x636   :  { %14 = sbr.rel (!%p12_p4) target bundleno = 1 (0x1), region = 70 }

</bundles_post_ra>
